<compile_context>
chip_gen: v7x
topology: tpu7x:2x2x1
jax: 0.10.0
libtpu: 0.0.40
codegen_flags: <defaults>
</compile_context>

<pallas_src>
import functools

import jax
import jax.numpy as jnp
from jax.experimental import pallas as pl
from jax.experimental.pallas import tpu as pltpu


def _round_up(n, m):
    return ((n + m - 1) // m) * m


def _make_dsconv_kernel(C_pad, N_mat, tap_offsets):
    """Kernel body for one batch sample (one grid step)."""

    def kernel(x_ref, w_ref, b_ref, o_ref, p_ref):
        # x_ref: (1, C_pad, L_pad)   one sample, channel- and lane-padded
        # w_ref: (C_out, K_pad)      fused effective weights, K_pad = T*C_pad
        # b_ref: (C_out, 1)          fused effective bias
        # o_ref: (1, C_out, N_mat)   lane-dense output slab (N_mat % 128 == 0)
        # p_ref: (K_pad, N_mat)      VMEM scratch: im2col patch matrix
        #
        # Build the patch matrix: tap t contributes an 8-sublane-aligned block
        # of rows holding the input shifted by d = i*W + j lanes.  Every store
        # is a full, unmasked (8,128)-tile write (C_pad % 8 == 0, N_mat % 128 == 0).
        for t, d in enumerate(tap_offsets):
            p_ref[t * C_pad:(t + 1) * C_pad, :] = x_ref[0, :, d:d + N_mat]
        # One fused MXU matmul (C_out, K_pad) @ (K_pad, N_mat), broadcast bias.
        out = jnp.dot(w_ref[...], p_ref[...], preferred_element_type=jnp.float32)
        o_ref[0, :, :] = out + b_ref[...]
        # TODO(synk): fuse downstream EEGNet BN / ELU / pooling here when this
        # block is embedded in the full network (VPU/EUP slots are idle).

    return kernel


def fuse_dsconv_params(dw_w, dw_b, pw_w, pw_b):
    """One-off weight transform — hoist out of the per-call path.

    Returns (w_eff, b_eff, KH, KW) with
      w_eff[o, t*C_pad + c] = pw[o, c] * dw[c, t]   (zero for padded channels)
      b_eff[o]              = sum_c pw[o, c] * dw_b[c] + pw_b[o]
    """
    C_in, _, KH, KW = dw_w.shape
    C_out = pw_w.shape[0]
    T = KH * KW
    C_pad = _round_up(C_in, 8)

    dw_k = dw_w.reshape(C_in, T).astype(jnp.float32)        # dw_k[c, t]
    pw = pw_w.reshape(C_out, C_in).astype(jnp.float32)      # pw[o, c]
    w_eff = pw[:, None, :] * dw_k.T[None, :, :]              # (C_out, T, C_in)
    w_eff = jnp.pad(w_eff, ((0, 0), (0, 0), (0, C_pad - C_in)))
    w_eff = w_eff.reshape(C_out, T * C_pad)
    b_eff = (pw @ dw_b.astype(jnp.float32)
             + pw_b.astype(jnp.float32)).reshape(C_out, 1)
    return w_eff, b_eff, KH, KW


@functools.partial(jax.jit, static_argnames=("KH", "KW"))
def dsconv_apply(x, w_eff, b_eff, *, KH, KW):
    """Fused depthwise-separable conv: (B, C_in, H, W) -> (B, C_out, Ho, Wo)."""
    B, C_in, H, W = x.shape
    C_out = w_eff.shape[0]
    Ho, Wo = H - KH + 1, W - KW + 1
    C_pad = _round_up(C_in, 8)
    K_pad = KH * KW * C_pad
    HW = H * W
    N_mat = _round_up(HW, 128)               # lane-dense matmul width
    d_max = (KH - 1) * W + (KW - 1)          # largest flattened tap offset
    L_pad = _round_up(N_mat + d_max, 128)    # padded flattened input length

    # ---- batch-major layout plumbing: free reshape + ONE zero pad ----
    xflat = x.astype(jnp.float32).reshape(B, C_in, HW)
    xflat = jnp.pad(xflat, ((0, 0), (0, C_pad - C_in), (0, L_pad - HW)))

    tap_offsets = tuple(i * W + j for i in range(KH) for j in range(KW))
    kernel = _make_dsconv_kernel(C_pad, N_mat, tap_offsets)

    out_flat = pl.pallas_call(
        kernel,
        out_shape=jax.ShapeDtypeStruct((B, C_out, N_mat), jnp.float32),
        grid=(B,),
        in_specs=[
            pl.BlockSpec((1, C_pad, L_pad), lambda b: (b, 0, 0)),
            pl.BlockSpec((C_out, K_pad), lambda b: (0, 0)),
            pl.BlockSpec((C_out, 1), lambda b: (0, 0)),
        ],
        out_specs=pl.BlockSpec((1, C_out, N_mat), lambda b: (b, 0, 0)),
        scratch_shapes=[pltpu.VMEM((K_pad, N_mat), jnp.float32)],
        compiler_params=pltpu.CompilerParams(
            dimension_semantics=("parallel",)),
    )(xflat, w_eff, b_eff)

    # ---- decode: lane axis of each sample is the flattened (H, W) grid ----
    # Invariant: columns with wo >= Wo or ho >= Ho carry wrapped taps and MUST
    # be discarded by the slice below (VALID padding, stride 1 only).
    if N_mat != HW:
        out_flat = out_flat[:, :, :HW]
    return out_flat.reshape(B, C_out, H, W)[:, :, :Ho, :Wo]


def depthwise_separable_conv(x, dw_w, dw_b, pw_w, pw_b):
    """Convenience wrapper matching the PyTorch module's forward signature."""
    w_eff, b_eff, KH, KW = fuse_dsconv_params(dw_w, dw_b, pw_w, pw_b)
    return dsconv_apply(x, w_eff, b_eff, KH=KH, KW=KW)


def reference(x, dw_w, dw_b, pw_w, pw_b):
    """Pure-JAX reference mirroring PyTorch Conv2d semantics."""
    C_in = x.shape[1]
    out = jax.lax.conv_general_dilated(
        x, dw_w, window_strides=(1, 1), padding="VALID",
        feature_group_count=C_in,
        dimension_numbers=("NCHW", "OIHW", "NCHW"))
    out = out + dw_b[None, :, None, None]
    out = jax.lax.conv_general_dilated(
        out, pw_w, window_strides=(1, 1), padding="VALID",
        dimension_numbers=("NCHW", "OIHW", "NCHW"))
    out = out + pw_b[None, :, None, None]
    return out


if __name__ == "__main__":
    B, C_in, C_out, H, W = 2, 4, 8, 16, 16
    KH = KW = 3

    key = jax.random.PRNGKey(0)
    kx, k1, k2, k3, k4 = jax.random.split(key, 5)

    x = jax.random.normal(kx, (B, C_in, H, W), dtype=jnp.float32)

    # PyTorch-style uniform init: U(-1/sqrt(fan_in), 1/sqrt(fan_in))
    dw_bound = 1.0 / jnp.sqrt(1.0 * KH * KW)          # depthwise fan_in = 1*KH*KW
    pw_bound = 1.0 / jnp.sqrt(1.0 * C_in)             # pointwise fan_in = C_in*1*1
    dw_w = jax.random.uniform(k1, (C_in, 1, KH, KW), jnp.float32, -dw_bound, dw_bound)
    dw_b = jax.random.uniform(k2, (C_in,), jnp.float32, -dw_bound, dw_bound)
    pw_w = jax.random.uniform(k3, (C_out, C_in, 1, 1), jnp.float32, -pw_bound, pw_bound)
    pw_b = jax.random.uniform(k4, (C_out,), jnp.float32, -pw_bound, pw_bound)

    # Hoisted one-off weight fusion (module init), then the jitted apply path.
    w_eff, b_eff, kh, kw = fuse_dsconv_params(dw_w, dw_b, pw_w, pw_b)
    w_eff, b_eff = jax.block_until_ready((w_eff, b_eff))

    out = dsconv_apply(x, w_eff, b_eff, KH=kh, KW=kw)
    out = jax.block_until_ready(out)

    ref = reference(x, dw_w, dw_b, pw_w, pw_b)
    err = float(jnp.max(jnp.abs(out - ref)))
    assert out.shape == (B, C_out, H - KH + 1, W - KW + 1), out.shape
    assert err < 1e-3, f"max abs error {err}"

    print("KERNEL_OK")
</pallas_src>

<mosaic_0001>
module attributes {stable_mosaic.version = 11 : i64} {
  func.func @kernel(%arg0: i32, %arg1: memref<1x8x384xf32, #tpu.memory_space<vmem>>, %arg2: memref<8x72xf32, #tpu.memory_space<vmem>>, %arg3: memref<8x1xf32, #tpu.memory_space<vmem>>, %arg4: memref<1x8x256xf32, #tpu.memory_space<vmem>>, %arg5: memref<72x256xf32, #tpu.memory_space<vmem>>) attributes {dimension_semantics = [#tpu.dimension_semantics<parallel>], iteration_bounds = array<i64: 2>, scalar_prefetch = 0 : i64, scratch_operands = 1 : i64, tpu.core_type = #tpu.core_type<tc>, window_params = [{transform_indices = @transform_0, window_bounds = array<i64: 1, 8, 384>}, {pipeline_mode = #tpu.pipeline_mode<synchronous>, transform_indices = @transform_1, window_bounds = array<i64: 8, 72>}, {pipeline_mode = #tpu.pipeline_mode<synchronous>, transform_indices = @transform_2, window_bounds = array<i64: 8, 1>}, {transform_indices = @transform_3, window_bounds = array<i64: 1, 8, 256>}]} {
    %c0 = arith.constant 0 : index
    %c0_0 = arith.constant 0 : index
    %c0_1 = arith.constant 0 : index
    %0 = vector.load %arg1[%c0, %c0_0, %c0_1] : memref<1x8x384xf32, #tpu.memory_space<vmem>>, vector<1x8x256xf32>
    %1 = vector.shape_cast %0 : vector<1x8x256xf32> to vector<8x256xf32>
    %c0_2 = arith.constant 0 : index
    %c0_3 = arith.constant 0 : index
    %2 = vector.load %arg5[%c0_2, %c0_3] : memref<72x256xf32, #tpu.memory_space<vmem>>, vector<8x256xf32>
    tpu.vector_store %arg5[%c0_2, %c0_3], %1 {strides = array<i32>} : memref<72x256xf32, #tpu.memory_space<vmem>>, vector<8x256xf32>,
    %c0_4 = arith.constant 0 : index
    %c0_5 = arith.constant 0 : index
    %c1 = arith.constant 1 : index
    %3 = vector.load %arg1[%c0_4, %c0_5, %c1] : memref<1x8x384xf32, #tpu.memory_space<vmem>>, vector<1x8x256xf32>
    %4 = vector.shape_cast %3 : vector<1x8x256xf32> to vector<8x256xf32>
    %c8 = arith.constant 8 : index
    %c0_6 = arith.constant 0 : index
    %5 = vector.load %arg5[%c8, %c0_6] : memref<72x256xf32, #tpu.memory_space<vmem>>, vector<8x256xf32>
    tpu.vector_store %arg5[%c8, %c0_6], %4 {strides = array<i32>} : memref<72x256xf32, #tpu.memory_space<vmem>>, vector<8x256xf32>,
    %c0_7 = arith.constant 0 : index
    %c0_8 = arith.constant 0 : index
    %c2 = arith.constant 2 : index
    %6 = vector.load %arg1[%c0_7, %c0_8, %c2] : memref<1x8x384xf32, #tpu.memory_space<vmem>>, vector<1x8x256xf32>
    %7 = vector.shape_cast %6 : vector<1x8x256xf32> to vector<8x256xf32>
    %c16 = arith.constant 16 : index
    %c0_9 = arith.constant 0 : index
    %8 = vector.load %arg5[%c16, %c0_9] : memref<72x256xf32, #tpu.memory_space<vmem>>, vector<8x256xf32>
    tpu.vector_store %arg5[%c16, %c0_9], %7 {strides = array<i32>} : memref<72x256xf32, #tpu.memory_space<vmem>>, vector<8x256xf32>,
    %c0_10 = arith.constant 0 : index
    %c0_11 = arith.constant 0 : index
    %c16_12 = arith.constant 16 : index
    %9 = vector.load %arg1[%c0_10, %c0_11, %c16_12] : memref<1x8x384xf32, #tpu.memory_space<vmem>>, vector<1x8x256xf32>
    %10 = vector.shape_cast %9 : vector<1x8x256xf32> to vector<8x256xf32>
    %c24 = arith.constant 24 : index
    %c0_13 = arith.constant 0 : index
    %11 = vector.load %arg5[%c24, %c0_13] : memref<72x256xf32, #tpu.memory_space<vmem>>, vector<8x256xf32>
    tpu.vector_store %arg5[%c24, %c0_13], %10 {strides = array<i32>} : memref<72x256xf32, #tpu.memory_space<vmem>>, vector<8x256xf32>,
    %c0_14 = arith.constant 0 : index
    %c0_15 = arith.constant 0 : index
    %c17 = arith.constant 17 : index
    %12 = vector.load %arg1[%c0_14, %c0_15, %c17] : memref<1x8x384xf32, #tpu.memory_space<vmem>>, vector<1x8x256xf32>
    %13 = vector.shape_cast %12 : vector<1x8x256xf32> to vector<8x256xf32>
    %c32 = arith.constant 32 : index
    %c0_16 = arith.constant 0 : index
    %14 = vector.load %arg5[%c32, %c0_16] : memref<72x256xf32, #tpu.memory_space<vmem>>, vector<8x256xf32>
    tpu.vector_store %arg5[%c32, %c0_16], %13 {strides = array<i32>} : memref<72x256xf32, #tpu.memory_space<vmem>>, vector<8x256xf32>,
    %c0_17 = arith.constant 0 : index
    %c0_18 = arith.constant 0 : index
    %c18 = arith.constant 18 : index
    %15 = vector.load %arg1[%c0_17, %c0_18, %c18] : memref<1x8x384xf32, #tpu.memory_space<vmem>>, vector<1x8x256xf32>
    %16 = vector.shape_cast %15 : vector<1x8x256xf32> to vector<8x256xf32>
    %c40 = arith.constant 40 : index
    %c0_19 = arith.constant 0 : index
    %17 = vector.load %arg5[%c40, %c0_19] : memref<72x256xf32, #tpu.memory_space<vmem>>, vector<8x256xf32>
    tpu.vector_store %arg5[%c40, %c0_19], %16 {strides = array<i32>} : memref<72x256xf32, #tpu.memory_space<vmem>>, vector<8x256xf32>,
    %c0_20 = arith.constant 0 : index
    %c0_21 = arith.constant 0 : index
    %c32_22 = arith.constant 32 : index
    %18 = vector.load %arg1[%c0_20, %c0_21, %c32_22] : memref<1x8x384xf32, #tpu.memory_space<vmem>>, vector<1x8x256xf32>
    %19 = vector.shape_cast %18 : vector<1x8x256xf32> to vector<8x256xf32>
    %c48 = arith.constant 48 : index
    %c0_23 = arith.constant 0 : index
    %20 = vector.load %arg5[%c48, %c0_23] : memref<72x256xf32, #tpu.memory_space<vmem>>, vector<8x256xf32>
    tpu.vector_store %arg5[%c48, %c0_23], %19 {strides = array<i32>} : memref<72x256xf32, #tpu.memory_space<vmem>>, vector<8x256xf32>,
    %c0_24 = arith.constant 0 : index
    %c0_25 = arith.constant 0 : index
    %c33 = arith.constant 33 : index
    %21 = vector.load %arg1[%c0_24, %c0_25, %c33] : memref<1x8x384xf32, #tpu.memory_space<vmem>>, vector<1x8x256xf32>
    %22 = vector.shape_cast %21 : vector<1x8x256xf32> to vector<8x256xf32>
    %c56 = arith.constant 56 : index
    %c0_26 = arith.constant 0 : index
    %23 = vector.load %arg5[%c56, %c0_26] : memref<72x256xf32, #tpu.memory_space<vmem>>, vector<8x256xf32>
    tpu.vector_store %arg5[%c56, %c0_26], %22 {strides = array<i32>} : memref<72x256xf32, #tpu.memory_space<vmem>>, vector<8x256xf32>,
    %c0_27 = arith.constant 0 : index
    %c0_28 = arith.constant 0 : index
    %c34 = arith.constant 34 : index
    %24 = vector.load %arg1[%c0_27, %c0_28, %c34] : memref<1x8x384xf32, #tpu.memory_space<vmem>>, vector<1x8x256xf32>
    %25 = vector.shape_cast %24 : vector<1x8x256xf32> to vector<8x256xf32>
    %c64 = arith.constant 64 : index
    %c0_29 = arith.constant 0 : index
    %26 = vector.load %arg5[%c64, %c0_29] : memref<72x256xf32, #tpu.memory_space<vmem>>, vector<8x256xf32>
    tpu.vector_store %arg5[%c64, %c0_29], %25 {strides = array<i32>} : memref<72x256xf32, #tpu.memory_space<vmem>>, vector<8x256xf32>,
    %c0_30 = arith.constant 0 : index
    %c0_31 = arith.constant 0 : index
    %27 = vector.load %arg2[%c0_30, %c0_31] : memref<8x72xf32, #tpu.memory_space<vmem>>, vector<8x72xf32>
    %c0_32 = arith.constant 0 : index
    %c0_33 = arith.constant 0 : index
    %28 = vector.load %arg5[%c0_32, %c0_33] : memref<72x256xf32, #tpu.memory_space<vmem>>, vector<72x256xf32>
    %cst = arith.constant dense<0.000000e+00> : vector<8x256xf32>
    %29 = tpu.matmul %27, %28, %cst {dimension_numbers = #tpu.dot_dimension_numbers<[1], [0], [0], [1], [0, 0, 1, 1], [], []>} : vector<8x72xf32>, vector<72x256xf32>, vector<8x256xf32> -> vector<8x256xf32>
    %c0_34 = arith.constant 0 : index
    %c0_35 = arith.constant 0 : index
    %30 = vector.load %arg3[%c0_34, %c0_35] : memref<8x1xf32, #tpu.memory_space<vmem>>, vector<8x1xf32>
    %31 = vector.broadcast %30 : vector<8x1xf32> to vector<8x256xf32>
    %32 = arith.addf %29, %31 : vector<8x256xf32>
    %c0_36 = arith.constant 0 : index
    %c0_37 = arith.constant 0 : index
    %c0_38 = arith.constant 0 : index
    %33 = vector.load %arg4[%c0_36, %c0_37, %c0_38] : memref<1x8x256xf32, #tpu.memory_space<vmem>>, vector<1x8x256xf32>
    %34 = vector.shape_cast %33 : vector<1x8x256xf32> to vector<8x256xf32>
    %35 = vector.shape_cast %32 : vector<8x256xf32> to vector<1x8x256xf32>
    tpu.vector_store %arg4[%c0_36, %c0_37, %c0_38], %35 {strides = array<i32>} : memref<1x8x256xf32, #tpu.memory_space<vmem>>, vector<1x8x256xf32>,
    return
  }
  func.func @transform_0(%arg0: i32) -> (i32, i32, i32) {
    %c0_i32 = arith.constant 0 : i32
    %c0_i32_0 = arith.constant 0 : i32
    %c0_i32_1 = arith.constant 0 : i32
    return %arg0, %c0_i32, %c0_i32_0 : i32, i32, i32
  }
  func.func @transform_1(%arg0: i32) -> (i32, i32) {
    %c0_i32 = arith.constant 0 : i32
    %c0_i32_0 = arith.constant 0 : i32
    %c0_i32_1 = arith.constant 0 : i32
    return %c0_i32, %c0_i32_0 : i32, i32
  }
  func.func @transform_2(%arg0: i32) -> (i32, i32) {
    %c0_i32 = arith.constant 0 : i32
    %c0_i32_0 = arith.constant 0 : i32
    %c0_i32_1 = arith.constant 0 : i32
    return %c0_i32, %c0_i32_0 : i32, i32
  }
  func.func @transform_3(%arg0: i32) -> (i32, i32, i32) {
    %c0_i32 = arith.constant 0 : i32
    %c0_i32_0 = arith.constant 0 : i32
    %c0_i32_1 = arith.constant 0 : i32
    return %arg0, %c0_i32, %c0_i32_0 : i32, i32, i32
  }
}

</mosaic_0001>

<bundles_post_ra>
// kernel: dsconv_apply.1
= control target key start
LH: loop header
LB: loop body
LE: loop exit
PB: predicated region body
PF: predicated region fallthrough
CT: control target
= control target key end

     0   :  { %s606_s12 = smov 0   ;;  %s633_s0 = inlined_call_operand.vmem [shape: f32[2,8,384], index: 0, kind: input, shape index: {}]   ;;  %s634_s1 = inlined_call_operand.vmem [shape: f32[8,72], index: 1, kind: input, shape index: {}]   ;;  %s635_s2 = inlined_call_operand.vmem [shape: f32[8,1], index: 2, kind: input, shape index: {}]   ;;  %s636_s3 = inlined_call_operand.vmem [shape: f32[2,8,256], index: 3, kind: output, shape index: {}]  }
   0x1 LB: > { %s484_s13 = sadd.s32 4294967295, %s574_s12   ;;  %p488_p0 = scmp.ge.s32.totalorder %s574_s12, 1  ;;  %s574_s12 = sphi %s606_s12, %s13_s12  }
   0x2   : > { %p137_p1 = scmp.lt.s32.totalorder %s574_s12, 3 }
   0x4   : > { %p138_p2 = pnand %p488_p0, %p137_p1 }
   0x5   : > { %p161_p3 = scmp.lt.s32.totalorder (!%p138_p2), %s484_s13, 1  ;;  %s576_s18 = smov (!%p138_p2), 126   ;;  %v583_v4 = vmov (!%p138_p2), 0.0   ;;  %v584_v5 = vmov (!%p138_p2), 0   ;;  %v346_v6 = vld [vmem:[%s635_s2] sm:$0xff] (!%p138_p2)  ;;  %vm187_vm0 = vcmask (!%p138_p2), 1039360  }
   0x6   : > { %141 = sbr.rel (%p138_p2) target bundleno = 385 (0x181), region = 32  ;;  %s577_s19 = smov (!%p138_p2), 127   ;;  %420 = vmatprep.mubr.f32.mxu0 (!%p138_p2), %v583_v4  ;;  %566 = vset.pattern.permute.xlu1 (!%p138_p2), %v584_v5  ;;  %vm225_vm1 = vcmask (!%p138_p2), 916480   ;;  %vm206_vm2 = vcmask (!%p138_p2), 1031168   ;;  %vm263_vm3 = vcmask (!%p138_p2), 900096   ;;  %vm244_vm4 = vcmask (!%p138_p2), 908288  }
   0x7   : > { %s578_s20 = smov (!%p138_p2), 112   ;;  %s579_s21 = smov (!%p138_p2), 110   ;;  %567 = vset.pattern.permute.xlu0 (!%p138_p2), %v584_v5  ;;  %vm301_vm5 = vcmask (!%p138_p2), 777216   ;;  %vm282_vm6 = vcmask (!%p138_p2), 785408   ;;  %vm320_vm7 = vcmask (!%p138_p2), 769024   ;;  %v327_v61 = vld [vmem:[%s634_s1] sm:$0xff] (!%p138_p2) }
   0x8   : > { %s580_s22 = smov (!%p138_p2), 111   ;;  %s581_s23 = smov (!%p138_p2), 95   ;;  %vm352_vm8 = vcmask (!%p138_p2), 588800  }
   0x9   : > { %s582_s24 = smov (!%p138_p2), 96   ;;  %s585_s25 = smov (!%p138_p2), 94  }
   0xd   : > { %s638_s13 = smov (!%p161_p3, %s484_s13), 1 }
   0xe   : > { %s512_s14 = smul.u32 24, %s638_s13  ;;  %s495_s30 = sshll.u32 %s638_s13, 4 }
   0xf   : > { %s170_s6 = scalar_lea.vmem %s636_s3, %s495_s30 }
  0x10   : > { %s165_s17 = scalar_lea.vmem %s633_s0, %s512_s14 }
  0x11   : > { %v195_v0 = vld [vmem:[%s165_s17 + $0x8] sm:$0xff]  ;;  %v196_v1 = vld [vmem:[%s165_s17 + $0x10] sm:$0xff]  ;;  %v175_v3 = vld [vmem:[%s165_s17] sm:$0xff] }
  0x12   : > { %v536_v2 = vpack.i.bf16 %v196_v1, %v195_v0 }
  0x14   : > { %537 = vrot.lane.b32.xlu1 %v536_v2, %s576_s18  ;;  %532 = vrot.lane.b32.xlu0 %v536_v2, %s577_s19 }
  0x18   : > { %542 = vrot.lane.b32.xlu1 %v536_v2, %s578_s20  ;;  %181 = vrot.lane.b32.xlu0 %v175_v3, %s577_s19 }
  0x1c   : > { %219 = vrot.lane.b32.xlu1 %v175_v3, %s578_s20  ;;  %200 = vrot.lane.b32.xlu0 %v175_v3, %s576_s18 }
  0x20   : > { %552 = vrot.lane.b32.xlu1 %v536_v2, %s579_s21  ;;  %547 = vrot.lane.b32.xlu0 %v536_v2, %s580_s22 }
  0x24   : > { %257 = vrot.lane.b32.xlu1 %v175_v3, %s579_s21  ;;  %238 = vrot.lane.b32.xlu0 %v175_v3, %s580_s22 }
  0x28   : > { %562 = vrot.lane.b32.xlu1 %v536_v2, %s581_s23  ;;  %557 = vrot.lane.b32.xlu0 %v536_v2, %s582_s24 }
  0x2c   : > { %295 = vrot.lane.b32.xlu1 %v175_v3, %s581_s23  ;;  %276 = vrot.lane.b32.xlu0 %v175_v3, %s582_s24 }
  0x30   : > { %318 = vrot.lane.b32.xlu1 %v196_v1, %s585_s25  ;;  %316 = vrot.lane.b32.xlu0 %v195_v0, %s585_s25 }
  0x34   : > { %314 = vrot.lane.b32.xlu0 %v175_v3, %s585_s25  ;;  %349 = vperm.xlu1 %566, %v346_v6  }
  0x86   : > { %v538_v7 = vpop.permute.xlu1 %537  ;;  %v533_v8 = vpop.permute.xlu0 %532 }
  0x87   : > { %v535_v9 = vunpack.i.h.bf16 %v533_v8  ;;  %v534_v10 = vunpack.i.l.bf16 %v533_v8  ;;  %v540_v11 = vunpack.i.h.bf16 %v538_v7  ;;  %v539_v12 = vunpack.i.l.bf16 %v538_v7 }
  0x89   : > { %v189_v13 = vsel %vm187_vm0, %v534_v10, %v535_v9  ;;  %v208_v21 = vsel %vm206_vm2, %v539_v12, %v540_v11 }
  0x8a   : > { %v543_v14 = vpop.permute.xlu1 %542  ;;  %v182_v15 = vpop.permute.xlu0 %181  ;;  %v496_v16 = vpack.c.bf16 %v189_v13, %v195_v0 }
  0x8b   : > { %v545_v17 = vunpack.i.h.bf16 %v543_v14  ;;  %v544_v18 = vunpack.i.l.bf16 %v543_v14  ;;  %v188_v19 = vsel %vm187_vm0, %v182_v15, %v534_v10 }
  0x8c   : > { %497 = vmatprep.subr.bf16.mxu0 %v496_v16  ;;  %v498_v20 = vpack.c.bf16 %v188_v19, %v175_v3 }
  0x8d   : > { %v227_v22 = vsel %vm225_vm1, %v544_v18, %v545_v17 }
  0x8e   : > { %v220_v23 = vpop.permute.xlu1 %219  ;;  %v201_v24 = vpop.permute.xlu0 %200  ;;  %499 = vmatpush1.bf16.msra.mxu0 %v498_v20  ;;  %v500_v25 = vpack.c.bf16 %v227_v22, %v208_v21 }
  0x8f   : > { %v226_v26 = vsel %vm225_vm1, %v220_v23, %v544_v18  ;;  %v207_v27 = vsel %vm206_vm2, %v201_v24, %v539_v12 }
  0x90   : > { %v502_v28 = vpack.c.bf16 %v226_v26, %v207_v27  ;;  %501 = vmatprep.subr.bf16.mxu0 %v500_v25 }
  0x92   : > { %v553_v29 = vpop.permute.xlu1 %552  ;;  %v548_v30 = vpop.permute.xlu0 %547  ;;  %503 = vmatpush1.bf16.msra.mxu0 %v502_v28 }
  0x93   : > { %v555_v31 = vunpack.i.h.bf16 %v553_v29  ;;  %v554_v32 = vunpack.i.l.bf16 %v553_v29  ;;  %v550_v33 = vunpack.i.h.bf16 %v548_v30  ;;  %v549_v34 = vunpack.i.l.bf16 %v548_v30 }
  0x95   : > { %v246_v35 = vsel %vm244_vm4, %v549_v34, %v550_v33  ;;  %v265_v36 = vsel %vm263_vm3, %v554_v32, %v555_v31 }
  0x96   : > { %v258_v37 = vpop.permute.xlu1 %257  ;;  %v239_v38 = vpop.permute.xlu0 %238  ;;  %v504_v39 = vpack.c.bf16 %v265_v36, %v246_v35 }
  0x97   : > { %v264_v40 = vsel %vm263_vm3, %v258_v37, %v554_v32  ;;  %v245_v41 = vsel %vm244_vm4, %v239_v38, %v549_v34 }
  0x98   : > { %v506_v42 = vpack.c.bf16 %v264_v40, %v245_v41  ;;  %505 = vmatprep.subr.bf16.mxu0 %v504_v39 }
  0x9a   : > { %v563_v43 = vpop.permute.xlu1 %562  ;;  %v558_v44 = vpop.permute.xlu0 %557  ;;  %507 = vmatpush1.bf16.msra.mxu0 %v506_v42 }
  0x9b   : > { %v565_v45 = vunpack.i.h.bf16 %v563_v43  ;;  %v564_v46 = vunpack.i.l.bf16 %v563_v43  ;;  %v560_v47 = vunpack.i.h.bf16 %v558_v44  ;;  %v559_v48 = vunpack.i.l.bf16 %v558_v44 }
  0x9d   : > { %v284_v49 = vsel %vm282_vm6, %v559_v48, %v560_v47  ;;  %v303_v50 = vsel %vm301_vm5, %v564_v46, %v565_v45 }
  0x9e   : > { %v296_v51 = vpop.permute.xlu1 %295  ;;  %v277_v52 = vpop.permute.xlu0 %276  ;;  %v508_v53 = vpack.c.bf16 %v303_v50, %v284_v49 }
  0x9f   : > { %v302_v54 = vsel %vm301_vm5, %v296_v51, %v564_v46  ;;  %v283_v55 = vsel %vm282_vm6, %v277_v52, %v559_v48 }
  0xa0   : > { %v510_v56 = vpack.c.bf16 %v302_v54, %v283_v55  ;;  %509 = vmatprep.subr.bf16.mxu0 %v508_v53 }
  0xa2   : > { %v319_v57 = vpop.permute.xlu1 %318  ;;  %v317_v58 = vpop.permute.xlu0 %316  ;;  %511 = vmatpush1.bf16.msra.mxu0 %v510_v56 }
  0xa3   : > { %v322_v59 = vsel %vm320_vm7, %v317_v58, %v319_v57 }
  0xa4   : > { %372 = vmatprep.subr.mxu0 %v322_v59 }
  0xa6   : > { %v315_v60 = vpop.permute.xlu0 %314 }
  0xa7   : > { %v321_v62 = vsel %vm320_vm7, %v315_v60, %v317_v58 }
  0xa8   : > { %373 = vmatpush1.msra.mxu0 %v321_v62 }
  0xa9   : > { %492 = vmatmul.mubr.msk.f32.vlgmr.msra.gmra.mrb[0].mxu0 %vm352_vm8, %v327_v61 }
  0xb3   : > { %v350_v63 = vpop.permute.xlu1 %349 }
 0x17c   : > { %v422_v0 = vpop.f32.mrb[0].mxu0 }
 0x17d   : > { %v423_v1 = vadd.f32 %v422_v0, %v350_v63  ;;  %v424_v2 = vpop.f32.mrb[1].mxu0 }
 0x17e   : > { %v425_v3 = vadd.f32 %v424_v2, %v350_v63 }
 0x17f   : > { %427 = vst [vmem:[%s170_s6] sm:$0xff] %v423_v1 }
 0x180   : > { %428 = vst [vmem:[%s170_s6 + $0x8] sm:$0xff] %v425_v3 }
 0x181 PF: > { %s13_s12 = sadd.s32 1, %s574_s12  }
 0x182   : > { %p10_p4 = scmp.ge.s32.totalorder %s13_s12, 4  }
 0x184   :  { %12 = sbr.rel (!%p10_p4) target bundleno = 1 (0x1), region = 62 }

</bundles_post_ra>
